<compile_context>
chip_gen: v7x
topology: tpu7x:2x2x1
jax: 0.10.0
libtpu: 0.0.40
codegen_flags: <defaults>
</compile_context>

<pallas_src>
from functools import partial

import jax
import jax.numpy as jnp
from jax.experimental import pallas as pl
from jax.experimental.pallas import tpu as pltpu


def _round_up(x, m):
    return -(-x // m) * m


# ----------------------------------------------------------------------------
# Packed-parameter layout (single HBM array, lane width L, tile-aligned rows)
# ----------------------------------------------------------------------------
def _param_layout(inc, nclusters, hiddens, outc):
    """Row layout of the packed parameter array.

    Segments (in order, every segment row-padded to a multiple of 8, all
    segments zero-padded to L lanes):
        W0    : k0_pad rows   (stacked [Wz; Wc], k0 = inc + nclusters)
        gb0   : 8 rows        (row0 = gamma, row1 = beta)
        [W_i  : L rows, gb_i : 8 rows]   for hidden layers 1..n-1
        W_out : L rows        (cols >= outc are zero)
        b_out : 8 rows        (row0 = bias)
    """
    L = max(128, max(_round_up(d, 128) for d in list(hiddens) + [outc]))
    k0_pad = _round_up(inc + nclusters, 8)
    n_hidden = len(hiddens)
    total_rows = k0_pad + 8 + (n_hidden - 1) * (L + 8) + L + 8
    return L, k0_pad, total_rows


# ----------------------------------------------------------------------------
# Pallas kernel: fused (Linear -> BN(batch stats) -> ReLU)* -> Linear
# ----------------------------------------------------------------------------
def _bn_relu(h, gamma, beta, eps):
    """Training-mode BatchNorm1d (biased batch stats) + ReLU, folded form.

    Single pass over h: var = max(E[h^2] - mu^2, 0) (clamped against
    cancellation); gamma is folded into the rsqrt result so normalize +
    affine is one multiply-add over the activation. The hidden Linear bias is
    omitted upstream because the mean subtraction cancels it exactly.
    """
    inv_n = 1.0 / h.shape[0]
    mu = jnp.sum(h, axis=0, keepdims=True) * inv_n
    ex2 = jnp.sum(h * h, axis=0, keepdims=True) * inv_n
    var = jnp.maximum(ex2 - mu * mu, 0.0)
    scale = gamma * jax.lax.rsqrt(var + eps)          # (1, L)
    shift = beta - mu * scale                         # (1, L)
    return jnp.maximum(h * scale + shift, 0.0)


def _make_mlp_kernel(inc, nclusters, hiddens, outc, matmul_dtype, eps=1e-5):
    """Kernel refs: z, c, packed_params, out, zc_scratch."""
    n_hidden = len(hiddens)
    L, k0_pad, _ = _param_layout(inc, nclusters, hiddens, outc)
    k0 = inc + nclusters
    cast = matmul_dtype != jnp.float32

    def mm(a, w):
        # Each activation feeds exactly one dot, so this is one cast per layer
        # when bf16 is enabled and zero casts on the (default) f32 path.
        if cast:
            a = a.astype(matmul_dtype)
            w = w.astype(matmul_dtype)
        return jnp.dot(a, w, preferred_element_type=jnp.float32)

    def kernel(z_ref, c_ref, p_ref, out_ref, zc_ref):
        # --- assemble z || c (|| 0 pad) in VMEM scratch: no HBM concat, one
        #     MXU pass for the first layer ---
        if k0_pad > k0:
            zc_ref[...] = jnp.zeros_like(zc_ref)
        zc_ref[:, 0:inc] = z_ref[...]
        zc_ref[:, inc:k0] = c_ref[...]

        # --- first hidden layer ---
        off = 0
        h = mm(zc_ref[...], p_ref[off:off + k0_pad, :])
        off += k0_pad
        gb = p_ref[off:off + 2, :]
        off += 8
        h = _bn_relu(h, gb[0:1, :], gb[1:2, :], eps)    # BN math stays f32

        # --- remaining hidden layers (weights row-padded to L -> dots stay
        #     fully tile-aligned; padded lanes are exact zeros) ---
        for _ in range(n_hidden - 1):
            h = mm(h, p_ref[off:off + L, :])
            off += L
            gb = p_ref[off:off + 2, :]
            off += 8
            h = _bn_relu(h, gb[0:1, :], gb[1:2, :], eps)

        # --- output Linear: lane-dense (L-wide) unmasked store ---
        h = mm(h, p_ref[off:off + L, :])
        off += L
        out_ref[...] = h + p_ref[off:off + 1, :]

    return kernel


def _full_spec(shape):
    # whole-array block resident in VMEM (no grid)
    return pl.BlockSpec(shape, lambda: (0,) * len(shape))


def _padded_tile_bytes(shape, dtype):
    """(8,128)-padded VMEM footprint of one array."""
    shape = tuple(shape)
    if len(shape) == 1:
        shape = (1,) + shape
    rows = _round_up(shape[-2], 8)
    cols = _round_up(shape[-1], 128)
    lead = 1
    for d in shape[:-2]:
        lead *= d
    return lead * rows * cols * jnp.dtype(dtype).itemsize


# ----------------------------------------------------------------------------
# Parameter construction (deterministic, synthetic) + packing
# ----------------------------------------------------------------------------
def init_discriminator_params(key, inc, outc, hiddens, nclusters):
    """Structured params (used by the pure-JAX reference and for packing)."""
    dims = [inc + nclusters] + list(hiddens)
    params = {"gb": [], "ws": [], "bs": []}
    for i in range(len(hiddens)):
        d_in, d_out = dims[i], dims[i + 1]
        key, kw, kb, kg, kbt = jax.random.split(key, 5)
        w = jax.random.normal(kw, (d_in, d_out), jnp.float32) * (2.0 / d_in) ** 0.5
        b = jax.random.normal(kb, (1, d_out), jnp.float32) * 0.1
        if i == 0:
            params["wz"] = w[:inc]
            params["wc"] = w[inc:]
        else:
            params["ws"].append(w)
        params["bs"].append(b)  # exactly cancelled by batch-stat BN
        gamma = 1.0 + 0.1 * jax.random.normal(kg, (1, d_out), jnp.float32)
        beta = 0.1 * jax.random.normal(kbt, (1, d_out), jnp.float32)
        params["gb"].append(jnp.concatenate([gamma, beta], axis=0))
    key, kw = jax.random.split(key)
    params["w_out"] = (jax.random.normal(kw, (dims[-1], outc), jnp.float32)
                       * (2.0 / dims[-1]) ** 0.5)
    params["b_out"] = jnp.zeros((1, outc), jnp.float32)
    return params


def pack_params(params, inc, nclusters, hiddens, outc):
    """Pack all parameters into one (total_rows, L) f32 array (1 DMA)."""
    L, k0_pad, total_rows = _param_layout(inc, nclusters, hiddens, outc)

    def blk(a, rows):
        r, c = a.shape
        return jnp.pad(a, ((0, rows - r), (0, L - c)))

    blocks = [blk(jnp.concatenate([params["wz"], params["wc"]], axis=0), k0_pad),
              blk(params["gb"][0], 8)]
    for i in range(1, len(hiddens)):
        blocks.append(blk(params["ws"][i - 1], L))
        blocks.append(blk(params["gb"][i], 8))
    blocks.append(blk(params["w_out"], L))
    blocks.append(blk(params["b_out"], 8))
    packed = jnp.concatenate(blocks, axis=0)
    assert packed.shape == (total_rows, L)
    return packed


# ----------------------------------------------------------------------------
# Forward wrapper (== Discriminator.forward -> {'logit': ...})
# ----------------------------------------------------------------------------
@partial(jax.jit, static_argnames=("inc", "nclusters", "hiddens", "outc",
                                   "matmul_dtype"))
def discriminator_forward(z_mean, cprobs, packed_params, *, inc, nclusters,
                          hiddens, outc, matmul_dtype=jnp.float32):
    # disc_condi_train == 'soft': cluster probs are a detached covariate.
    cprobs = jax.lax.stop_gradient(cprobs)
    # gradient_reversal is identity on the forward pass.
    z_mean = z_mean.astype(jnp.float32)
    cprobs = cprobs.astype(jnp.float32)

    batch = z_mean.shape[0]
    L, k0_pad, total_rows = _param_layout(inc, nclusters, hiddens, outc)

    # Single invocation (grid=()), so the resident footprint is just the
    # un-multi-buffered sum of the tiles below.
    resident = (_padded_tile_bytes((batch, inc), jnp.float32)
                + _padded_tile_bytes((batch, nclusters), jnp.float32)
                + _padded_tile_bytes((total_rows, L), jnp.float32)
                + _padded_tile_bytes((batch, L), jnp.float32)        # output
                + _padded_tile_bytes((batch, k0_pad), jnp.float32))  # scratch

    compiler_params = None
    if resident > (16 << 20):  # below the default scoped limit on every gen
        try:
            cap = int(pltpu.get_tpu_info().vmem_capacity_bytes) * 3 // 4
        except Exception:
            cap = 48 << 20     # safe on every generation (v7x: 64 MiB per TC)
        compiler_params = pltpu.CompilerParams(
            vmem_limit_bytes=min(resident * 3 // 2, cap))

    kernel = _make_mlp_kernel(inc, nclusters, hiddens, outc, matmul_dtype)
    logit_pad = pl.pallas_call(
        kernel,
        out_shape=jax.ShapeDtypeStruct((batch, L), jnp.float32),
        in_specs=[_full_spec(z_mean.shape),
                  _full_spec(cprobs.shape),
                  _full_spec(packed_params.shape)],
        out_specs=_full_spec((batch, L)),
        scratch_shapes=[pltpu.VMEM((batch, k0_pad), jnp.float32)],
        compiler_params=compiler_params,
    )(z_mean, cprobs, packed_params)
    return {"logit": logit_pad[:, :outc]}


# ----------------------------------------------------------------------------
# Pure-JAX reference (faithful PyTorch forward incl. hidden biases)
# ----------------------------------------------------------------------------
def _reference(z_mean, cprobs, params, eps=1e-5):
    n_hidden = len(params["gb"])
    h = jnp.concatenate([z_mean, cprobs], axis=1)
    ws = [jnp.concatenate([params["wz"], params["wc"]], axis=0)] + list(params["ws"])
    for i in range(n_hidden):
        h = h @ ws[i] + params["bs"][i]   # hidden bias kept: proves it cancels
        mu = jnp.mean(h, axis=0, keepdims=True)
        var = jnp.mean((h - mu) ** 2, axis=0, keepdims=True)
        h = (h - mu) / jnp.sqrt(var + eps)
        g, beta = params["gb"][i][0:1], params["gb"][i][1:2]
        h = jnp.maximum(h * g + beta, 0.0)
    return h @ params["w_out"] + params["b_out"]


if __name__ == "__main__":
    # Shapes consistent with the module: inc (latent dim)=16, nclusters=4
    # (soft conditioning), hiddens=[32, 32], outc=3 (criterion='ce' -> outc>1),
    # batch=8.
    inc, nclusters, outc = 16, 4, 3
    hiddens = (32, 32)
    batch = 8

    key = jax.random.PRNGKey(0)
    k_z, k_c, k_p = jax.random.split(key, 3)
    z_mean = jax.random.normal(k_z, (batch, inc), jnp.float32)        # enc_res['z'].mean
    cprobs = jax.nn.softmax(
        jax.random.normal(k_c, (batch, nclusters), jnp.float32), axis=-1
    )                                                                  # enc_res['c'].probs

    params = init_discriminator_params(k_p, inc, outc, list(hiddens), nclusters)
    packed = pack_params(params, inc, nclusters, list(hiddens), outc)
    ref = _reference(z_mean, cprobs, params)

    # f32 path (default; exact semantics check)
    out = discriminator_forward(z_mean, cprobs, packed, inc=inc,
                                nclusters=nclusters, hiddens=hiddens, outc=outc)
    logit = jax.block_until_ready(out["logit"])
    assert logit.shape == (batch, outc)
    assert jnp.allclose(logit, ref, atol=1e-4, rtol=1e-4), "f32 mismatch vs reference"

    # optional bf16-matmul path (only worth it for large MXU-bound batches;
    # BN / elementwise math stays f32)
    out_bf16 = discriminator_forward(z_mean, cprobs, packed, inc=inc,
                                     nclusters=nclusters, hiddens=hiddens,
                                     outc=outc, matmul_dtype=jnp.bfloat16)
    logit_bf16 = jax.block_until_ready(out_bf16["logit"])
    assert logit_bf16.shape == (batch, outc)
    assert bool(jnp.all(jnp.isfinite(logit_bf16)))
    assert jnp.allclose(logit_bf16, ref, atol=3e-1, rtol=1e-1), "bf16 drift too large"

    print("KERNEL_OK")
</pallas_src>

<mosaic_0001>
module attributes {stable_mosaic.version = 11 : i64} {
  func.func @kernel(%arg0: memref<8x16xf32, #tpu.memory_space<vmem>>, %arg1: memref<8x4xf32, #tpu.memory_space<vmem>>, %arg2: memref<304x128xf32, #tpu.memory_space<vmem>>, %arg3: memref<8x128xf32, #tpu.memory_space<vmem>>, %arg4: memref<8x24xf32, #tpu.memory_space<vmem>>) attributes {dimension_semantics = [], scalar_prefetch = 0 : i64, scratch_operands = 1 : i64, tpu.core_type = #tpu.core_type<tc>} {
    %cst = arith.constant 0.000000e+00 : f32
    %0 = vector.broadcast %cst : f32 to vector<8x24xf32>
    %c0 = arith.constant 0 : index
    %c0_0 = arith.constant 0 : index
    %1 = vector.load %arg4[%c0, %c0_0] : memref<8x24xf32, #tpu.memory_space<vmem>>, vector<8x24xf32>
    tpu.vector_store %arg4[%c0, %c0_0], %0 {strides = array<i32>} : memref<8x24xf32, #tpu.memory_space<vmem>>, vector<8x24xf32>,
    %c0_1 = arith.constant 0 : index
    %c0_2 = arith.constant 0 : index
    %2 = vector.load %arg0[%c0_1, %c0_2] : memref<8x16xf32, #tpu.memory_space<vmem>>, vector<8x16xf32>
    %c0_3 = arith.constant 0 : index
    %c0_4 = arith.constant 0 : index
    %3 = vector.load %arg4[%c0_3, %c0_4] : memref<8x24xf32, #tpu.memory_space<vmem>>, vector<8x16xf32>
    tpu.vector_store %arg4[%c0_3, %c0_4], %2 {strides = array<i32>} : memref<8x24xf32, #tpu.memory_space<vmem>>, vector<8x16xf32>,
    %c0_5 = arith.constant 0 : index
    %c0_6 = arith.constant 0 : index
    %4 = vector.load %arg1[%c0_5, %c0_6] : memref<8x4xf32, #tpu.memory_space<vmem>>, vector<8x4xf32>
    %c0_7 = arith.constant 0 : index
    %c16 = arith.constant 16 : index
    %5 = vector.load %arg4[%c0_7, %c16] : memref<8x24xf32, #tpu.memory_space<vmem>>, vector<8x4xf32>
    tpu.vector_store %arg4[%c0_7, %c16], %4 {strides = array<i32>} : memref<8x24xf32, #tpu.memory_space<vmem>>, vector<8x4xf32>,
    %c0_8 = arith.constant 0 : index
    %c0_9 = arith.constant 0 : index
    %6 = vector.load %arg4[%c0_8, %c0_9] : memref<8x24xf32, #tpu.memory_space<vmem>>, vector<8x24xf32>
    %c0_10 = arith.constant 0 : index
    %c0_11 = arith.constant 0 : index
    %7 = vector.load %arg2[%c0_10, %c0_11] : memref<304x128xf32, #tpu.memory_space<vmem>>, vector<24x128xf32>
    %cst_12 = arith.constant dense<0.000000e+00> : vector<8x128xf32>
    %8 = tpu.matmul %6, %7, %cst_12 {dimension_numbers = #tpu.dot_dimension_numbers<[1], [0], [0], [1], [0, 0, 1, 1], [], []>} : vector<8x24xf32>, vector<24x128xf32>, vector<8x128xf32> -> vector<8x128xf32>
    %c24 = arith.constant 24 : index
    %c0_13 = arith.constant 0 : index
    %9 = vector.load %arg2[%c24, %c0_13] : memref<304x128xf32, #tpu.memory_space<vmem>>, vector<2x128xf32>
    %10 = vector.extract_strided_slice %9 {offsets = [0, 0], sizes = [1, 128], strides = [1, 1]} : vector<2x128xf32> to vector<1x128xf32>
    %11 = vector.extract_strided_slice %9 {offsets = [1, 0], sizes = [1, 128], strides = [1, 1]} : vector<2x128xf32> to vector<1x128xf32>
    %cst_14 = arith.constant dense<0.000000e+00> : vector<128xf32>
    %12 = vector.multi_reduction <add>, %8, %cst_14 [0] : vector<8x128xf32> to vector<128xf32>
    %13 = vector.shape_cast %12 : vector<128xf32> to vector<1x128xf32>
    %cst_15 = arith.constant 1.250000e-01 : f32
    %14 = vector.broadcast %cst_15 : f32 to vector<1x128xf32>
    %15 = arith.mulf %13, %14 : vector<1x128xf32>
    %16 = arith.mulf %8, %8 : vector<8x128xf32>
    %cst_16 = arith.constant dense<0.000000e+00> : vector<128xf32>
    %17 = vector.multi_reduction <add>, %16, %cst_16 [0] : vector<8x128xf32> to vector<128xf32>
    %18 = vector.shape_cast %17 : vector<128xf32> to vector<1x128xf32>
    %cst_17 = arith.constant 1.250000e-01 : f32
    %19 = vector.broadcast %cst_17 : f32 to vector<1x128xf32>
    %20 = arith.mulf %18, %19 : vector<1x128xf32>
    %21 = arith.mulf %15, %15 : vector<1x128xf32>
    %22 = arith.subf %20, %21 : vector<1x128xf32>
    %cst_18 = arith.constant 0.000000e+00 : f32
    %23 = vector.broadcast %cst_18 : f32 to vector<1x128xf32>
    %24 = arith.maximumf %22, %23 : vector<1x128xf32>
    %cst_19 = arith.constant 9.99999974E-6 : f32
    %25 = vector.broadcast %cst_19 : f32 to vector<1x128xf32>
    %26 = arith.addf %24, %25 : vector<1x128xf32>
    %27 = math.rsqrt %26 : vector<1x128xf32>
    %28 = arith.mulf %10, %27 : vector<1x128xf32>
    %29 = arith.mulf %15, %28 : vector<1x128xf32>
    %30 = arith.subf %11, %29 : vector<1x128xf32>
    %31 = vector.broadcast %28 : vector<1x128xf32> to vector<8x128xf32>
    %32 = arith.mulf %8, %31 : vector<8x128xf32>
    %33 = vector.broadcast %30 : vector<1x128xf32> to vector<8x128xf32>
    %34 = arith.addf %32, %33 : vector<8x128xf32>
    %cst_20 = arith.constant 0.000000e+00 : f32
    %35 = vector.broadcast %cst_20 : f32 to vector<8x128xf32>
    %36 = arith.maximumf %34, %35 : vector<8x128xf32>
    %c32 = arith.constant 32 : index
    %c0_21 = arith.constant 0 : index
    %37 = vector.load %arg2[%c32, %c0_21] : memref<304x128xf32, #tpu.memory_space<vmem>>, vector<128x128xf32>
    %cst_22 = arith.constant dense<0.000000e+00> : vector<8x128xf32>
    %38 = tpu.matmul %36, %37, %cst_22 {dimension_numbers = #tpu.dot_dimension_numbers<[1], [0], [0], [1], [0, 0, 1, 1], [], []>} : vector<8x128xf32>, vector<128x128xf32>, vector<8x128xf32> -> vector<8x128xf32>
    %c160 = arith.constant 160 : index
    %c0_23 = arith.constant 0 : index
    %39 = vector.load %arg2[%c160, %c0_23] : memref<304x128xf32, #tpu.memory_space<vmem>>, vector<2x128xf32>
    %40 = vector.extract_strided_slice %39 {offsets = [0, 0], sizes = [1, 128], strides = [1, 1]} : vector<2x128xf32> to vector<1x128xf32>
    %41 = vector.extract_strided_slice %39 {offsets = [1, 0], sizes = [1, 128], strides = [1, 1]} : vector<2x128xf32> to vector<1x128xf32>
    %cst_24 = arith.constant dense<0.000000e+00> : vector<128xf32>
    %42 = vector.multi_reduction <add>, %38, %cst_24 [0] : vector<8x128xf32> to vector<128xf32>
    %43 = vector.shape_cast %42 : vector<128xf32> to vector<1x128xf32>
    %cst_25 = arith.constant 1.250000e-01 : f32
    %44 = vector.broadcast %cst_25 : f32 to vector<1x128xf32>
    %45 = arith.mulf %43, %44 : vector<1x128xf32>
    %46 = arith.mulf %38, %38 : vector<8x128xf32>
    %cst_26 = arith.constant dense<0.000000e+00> : vector<128xf32>
    %47 = vector.multi_reduction <add>, %46, %cst_26 [0] : vector<8x128xf32> to vector<128xf32>
    %48 = vector.shape_cast %47 : vector<128xf32> to vector<1x128xf32>
    %cst_27 = arith.constant 1.250000e-01 : f32
    %49 = vector.broadcast %cst_27 : f32 to vector<1x128xf32>
    %50 = arith.mulf %48, %49 : vector<1x128xf32>
    %51 = arith.mulf %45, %45 : vector<1x128xf32>
    %52 = arith.subf %50, %51 : vector<1x128xf32>
    %cst_28 = arith.constant 0.000000e+00 : f32
    %53 = vector.broadcast %cst_28 : f32 to vector<1x128xf32>
    %54 = arith.maximumf %52, %53 : vector<1x128xf32>
    %cst_29 = arith.constant 9.99999974E-6 : f32
    %55 = vector.broadcast %cst_29 : f32 to vector<1x128xf32>
    %56 = arith.addf %54, %55 : vector<1x128xf32>
    %57 = math.rsqrt %56 : vector<1x128xf32>
    %58 = arith.mulf %40, %57 : vector<1x128xf32>
    %59 = arith.mulf %45, %58 : vector<1x128xf32>
    %60 = arith.subf %41, %59 : vector<1x128xf32>
    %61 = vector.broadcast %58 : vector<1x128xf32> to vector<8x128xf32>
    %62 = arith.mulf %38, %61 : vector<8x128xf32>
    %63 = vector.broadcast %60 : vector<1x128xf32> to vector<8x128xf32>
    %64 = arith.addf %62, %63 : vector<8x128xf32>
    %cst_30 = arith.constant 0.000000e+00 : f32
    %65 = vector.broadcast %cst_30 : f32 to vector<8x128xf32>
    %66 = arith.maximumf %64, %65 : vector<8x128xf32>
    %c168 = arith.constant 168 : index
    %c0_31 = arith.constant 0 : index
    %67 = vector.load %arg2[%c168, %c0_31] : memref<304x128xf32, #tpu.memory_space<vmem>>, vector<128x128xf32>
    %cst_32 = arith.constant dense<0.000000e+00> : vector<8x128xf32>
    %68 = tpu.matmul %66, %67, %cst_32 {dimension_numbers = #tpu.dot_dimension_numbers<[1], [0], [0], [1], [0, 0, 1, 1], [], []>} : vector<8x128xf32>, vector<128x128xf32>, vector<8x128xf32> -> vector<8x128xf32>
    %c296 = arith.constant 296 : index
    %c0_33 = arith.constant 0 : index
    %69 = vector.load %arg2[%c296, %c0_33] : memref<304x128xf32, #tpu.memory_space<vmem>>, vector<1x128xf32>
    %70 = vector.broadcast %69 : vector<1x128xf32> to vector<8x128xf32>
    %71 = arith.addf %68, %70 : vector<8x128xf32>
    %c0_34 = arith.constant 0 : index
    %c0_35 = arith.constant 0 : index
    %72 = vector.load %arg3[%c0_34, %c0_35] : memref<8x128xf32, #tpu.memory_space<vmem>>, vector<8x128xf32>
    tpu.vector_store %arg3[%c0_34, %c0_35], %71 {strides = array<i32>} : memref<8x128xf32, #tpu.memory_space<vmem>>, vector<8x128xf32>,
    return
  }
}

</mosaic_0001>

<bundles_post_ra>
// kernel: discriminator_forward.1
= control target key start
LH: loop header
LB: loop body
LE: loop exit
PB: predicated region body
PF: predicated region fallthrough
CT: control target
= control target key end

     0   :  { %8 = vsyncpa [#allocation4], 0  ;;  %s581_s12 = smov [#allocation3]   ;;  %s663_s0 = inlined_call_operand.vmem [shape: f32[8,16], index: 0, kind: input, shape index: {}]   ;;  %s664_s1 = inlined_call_operand.vmem [shape: f32[8,4], index: 1, kind: input, shape index: {}]   ;;  %s665_s2 = inlined_call_operand.hbm [shape: f32[304,128], index: 2, kind: input, shape index: {}]   ;;  %s666_s3 = inlined_call_operand.vmem [shape: f32[8,128], index: 3, kind: output, shape index: {}]  }
   0x1   :  { %s18_s13 = sshll.u32 %s581_s12, 4  ;;  %s557_s16 = scalar_lea.hbm %s665_s2, 4864  ;;  %s19_s13 = int_to_ptr.vmem [resolvable:$true] %s18_s13 }
   0x2   :  { %p558_p0 = scmp.ne.s32.totalorder %s665_s2, %s557_s16  ;;  %p561_p1 = scmp.lt.u32.totalorder %s557_s16, %s665_s2 }
   0x4   :  { %p563_p2 = pnand %p561_p1, %p558_p0 }
   0x6   :  { %566 = shalt.err (!%p563_p2)
}
   0x7   :  { %s567_s21 = scalar_lea.vmem %s19_s13, 4864  ;;  %p572_p4 = scmp.lt.s32.totalorder %s19_s13, %s19_s13 }
   0x8   :  { %p568_p3 = scmp.ne.s32.totalorder %s19_s13, %s567_s21  ;;  %p573_p5 = scmp.lt.s32.totalorder %s567_s21, %s567_s21 }
   0xa   :  { %p574_p6 = por %p573_p5, %p572_p4 }
   0xc   :  { %p575_p7 = pnand %p574_p6, %p568_p3 }
   0xe   :  { %578 = shalt.err (!%p575_p7)
}
   0xf   :  { %s582_s22 = smov 128   ;;  %s583_s23 = smov 8  }
  0x10   :  { %24 = dma.hbm_to_vmem [thread:$0]  %s665_s2, 4864, %s19_s13, [#allocation4], %s582_s22, %s582_s22, %s583_s23  }
  0x11   :  { %579 = dma.done.wait [#allocation4], 4864  }
  0x12   :  { %580 = vsyncadd [#allocation4], 4294962432  ;;  %vm28_vm0 = vcmask 195584   ;;  %v584_v0 = vmov 0.0   ;;  %v585_v1 = vmov 0.0|0.0   ;;  %vm586_vm1 = vmmov 0  }
  0x13   :  { %29 = vst.msk [vmem:[#allocation2] sm:$0xff] %vm28_vm0, %v584_v0  ;;  %495 = vmatprep.subr.bf16.mxu0 %v585_v1  ;;  %422 = vmatprep.mubr.msk.f32.mxu0 %vm586_vm1, %v584_v0  ;;  %vm31_vm2 = vcmask 130048   ;;  %v33_v2 = vld [vmem:[%s664_s1] sm:$0xff]  ;;  %v41_v4 = vld [vmem:[#allocation3] sm:$0xff]  ;;  %s587_s29 = smov 16   ;;  %v42_v5 = vld [vmem:[#allocation3 + $0x8] sm:$0xff]  ;;  %v144_v55 = vlaneseq }
  0x14   :  { %498 = vmatprep.subr.bf16.mxu1 %v585_v1  ;;  %457 = vmatprep.mubr.msk.f32.mxu1 %vm586_vm1, %v584_v0  ;;  %v30_v3 = vld [vmem:[%s663_s0] sm:$0xff]  ;;  %v496_v6 = vpack.c.bf16 %v42_v5, %v41_v4  ;;  %v43_v7 = vld [vmem:[#allocation3 + $0x10] sm:$0xff]  ;;  %vm38_vm3 = vcmask 162944   ;;  %v155_v10 = vld [vmem:[#allocation3 + $0x20] sm:$0xff] }
  0x15   :  { %35 = vrot.lane.b32.xlu0 %v33_v2, %s587_s29  ;;  %32 = vst.msk [vmem:[#allocation2] sm:$0xff] %vm31_vm2, %v30_v3  ;;  %v156_v11 = vld [vmem:[#allocation3 + $0x28] sm:$0xff]  ;;  %v157_v13 = vld [vmem:[#allocation3 + $0x30] sm:$0xff]  ;;  %v158_v14 = vld [vmem:[#allocation3 + $0x38] sm:$0xff]  ;;  %v641_v56 = vshrl.u32 %v144_v55, 7 }
  0x16   :  { %497 = vmatpush3.bf16.msra.mxu0 %v496_v6  ;;  %v499_v12 = vpack.c.bf16 %v156_v11, %v155_v10  ;;  %v502_v15 = vpack.c.bf16 %v158_v14, %v157_v13  ;;  %v159_v16 = vld [vmem:[#allocation3 + $0x40] sm:$0xff]  ;;  %v160_v17 = vld [vmem:[#allocation3 + $0x48] sm:$0xff]  ;;  %v161_v19 = vld [vmem:[#allocation3 + $0x50] sm:$0xff] }
  0x17   :  { %420 = vmatprep.subr.mxu0 %v584_v0  ;;  %v505_v18 = vpack.c.bf16 %v160_v17, %v159_v16  ;;  %v162_v20 = vld [vmem:[#allocation3 + $0x58] sm:$0xff]  ;;  %v163_v22 = vld [vmem:[#allocation3 + $0x60] sm:$0xff]  ;;  %v164_v23 = vld [vmem:[#allocation3 + $0x68] sm:$0xff]  ;;  %v146_v60 = vsub.s32 0, %v641_v56 }
  0x18   :  { %500 = vmatpush3.bf16.msra.mxu1 %v499_v12  ;;  %v508_v21 = vpack.c.bf16 %v162_v20, %v161_v19  ;;  %v511_v24 = vpack.c.bf16 %v164_v23, %v163_v22  ;;  %v165_v25 = vld [vmem:[#allocation3 + $0x70] sm:$0xff]  ;;  %v166_v26 = vld [vmem:[#allocation3 + $0x78] sm:$0xff]  ;;  %v167_v28 = vld [vmem:[#allocation3 + $0x80] sm:$0xff] }
  0x19   :  { %501 = vmatprep.subr.bf16.mxu1 %v585_v1  ;;  %v514_v27 = vpack.c.bf16 %v166_v26, %v165_v25  ;;  %v168_v29 = vld [vmem:[#allocation3 + $0x88] sm:$0xff]  ;;  %v169_v30 = vld [vmem:[#allocation3 + $0x90] sm:$0xff]  ;;  %v170_v32 = vld [vmem:[#allocation3 + $0x98] sm:$0xff] }
  0x1a   :  { %421 = vmatpush3.msra.mxu0 %v43_v7  ;;  %v517_v31 = vpack.c.bf16 %v168_v29, %v167_v28  ;;  %v520_v33 = vpack.c.bf16 %v170_v32, %v169_v30  ;;  %v117_v57 = vld [vmem:[#allocation3 + $0x18] sm:$0x3]  ;;  %v279_v7 = vld [vmem:[#allocation3 + $0xa8] sm:$0xff]  ;;  %v282_v11 = vld [vmem:[#allocation3 + $0xc0] sm:$0xff] }
  0x1b   :  { %522 = vmatprep.subr.bf16.mxu0 %v585_v1  ;;  %v281_v10 = vld [vmem:[#allocation3 + $0xb8] sm:$0xff]  ;;  %v283_v13 = vld [vmem:[#allocation3 + $0xc8] sm:$0xff]  ;;  %v284_v14 = vld [vmem:[#allocation3 + $0xd0] sm:$0xff] }
  0x1c   :  { %503 = vmatpush3.bf16.msra.mxu1 %v502_v15  ;;  %v526_v12 = vpack.c.bf16 %v282_v11, %v281_v10  ;;  %v529_v15 = vpack.c.bf16 %v284_v14, %v283_v13  ;;  %v285_v16 = vld [vmem:[#allocation3 + $0xd8] sm:$0xff]  ;;  %v286_v17 = vld [vmem:[#allocation3 + $0xe0] sm:$0xff]  ;;  %v287_v19 = vld [vmem:[#allocation3 + $0xe8] sm:$0xff] }
  0x1d   :  { %504 = vmatprep.subr.bf16.mxu1 %v585_v1  ;;  %v288_v20 = vld [vmem:[#allocation3 + $0xf0] sm:$0xff]  ;;  %v289_v22 = vld [vmem:[#allocation3 + $0xf8] sm:$0xff]  ;;  %v290_v23 = vld [vmem:[#allocation3 + $0x100] sm:$0xff] }
  0x1e   :  { %v291_v25 = vld [vmem:[#allocation3 + $0x108] sm:$0xff]  ;;  %v292_v26 = vld [vmem:[#allocation3 + $0x110] sm:$0xff]  ;;  %v293_v28 = vld [vmem:[#allocation3 + $0x118] sm:$0xff] }
  0x1f   :  { %v294_v29 = vld [vmem:[#allocation3 + $0x120] sm:$0xff] }
  0x20   :  { %506 = vmatpush3.bf16.msra.mxu1 %v505_v18  ;;  %v532_v18 = vpack.c.bf16 %v286_v17, %v285_v16  ;;  %v544_v30 = vpack.c.bf16 %v294_v29, %v293_v28 }
  0x21   :  { %507 = vmatprep.subr.bf16.mxu1 %v585_v1 }
  0x24   :  { %509 = vmatpush3.bf16.msra.mxu1 %v508_v21  ;;  %v535_v21 = vpack.c.bf16 %v288_v20, %v287_v19 }
  0x25   :  { %510 = vmatprep.subr.bf16.mxu1 %v585_v1 }
  0x28   :  { %512 = vmatpush3.bf16.msra.mxu1 %v511_v24  ;;  %v538_v24 = vpack.c.bf16 %v290_v23, %v289_v22 }
  0x29   :  { %513 = vmatprep.subr.bf16.mxu1 %v585_v1 }
  0x2c   :  { %515 = vmatpush3.bf16.msra.mxu1 %v514_v27  ;;  %v541_v27 = vpack.c.bf16 %v292_v26, %v291_v25 }
  0x2d   :  { %516 = vmatprep.subr.bf16.mxu1 %v585_v1 }
  0x30   :  { %518 = vmatpush3.bf16.msra.mxu1 %v517_v31 }
  0x31   :  { %519 = vmatprep.subr.bf16.mxu1 %v585_v1 }
  0x34   :  { %521 = vmatpush3.bf16.msra.mxu1 %v520_v33 }
  0x87   :  { %v36_v8 = vpop.permute.xlu0 %35 }
  0x88   :  { %39 = vst.msk [vmem:[#allocation2] sm:$0xff] %vm38_vm3, %v36_v8  ;;  %v280_v8 = vld [vmem:[#allocation3 + $0xb0] sm:$0xff] }
  0x8f   :  { %v40_v9 = vld [vmem:[#allocation2] sm:$0xff] }
  0x90   :  { %423 = vmatmul.mubr.msk.f32.vlgmr.msra.gmra.mrb[0].mxu0 %vm28_vm0, %v40_v9  ;;  %v523_v9 = vpack.c.bf16 %v280_v8, %v279_v7 }
  0x91   :  { %492 = vmatprep.mubr.msk.f32.mxu0 %vm586_vm1, %v584_v0  ;;  %v151_v0 = vsub.s32 1, %v641_v56 }
  0x92   :  { %524 = vmatpush3.bf16.msra.mxu0 %v523_v9 }
  0x93   :  { %525 = vmatprep.subr.bf16.mxu0 %v585_v1 }
  0x96   :  { %527 = vmatpush3.bf16.msra.mxu0 %v526_v12 }
  0x97   :  { %528 = vmatprep.subr.bf16.mxu0 %v585_v1 }
  0x9a   :  { %530 = vmatpush3.bf16.msra.mxu0 %v529_v15 }
  0x9b   :  { %531 = vmatprep.subr.bf16.mxu0 %v585_v1 }
  0x9e   :  { %533 = vmatpush3.bf16.msra.mxu0 %v532_v18 }
  0x9f   :  { %534 = vmatprep.subr.bf16.mxu0 %v585_v1 }
  0xa2   :  { %536 = vmatpush3.bf16.msra.mxu0 %v535_v21 }
  0xa3   :  { %537 = vmatprep.subr.bf16.mxu0 %v585_v1 }
  0xa6   :  { %539 = vmatpush3.bf16.msra.mxu0 %v538_v24 }
  0xa7   :  { %540 = vmatprep.subr.bf16.mxu0 %v585_v1 }
  0xaa   :  { %542 = vmatpush3.bf16.msra.mxu0 %v541_v27 }
  0xab   :  { %543 = vmatprep.subr.bf16.mxu0 %v585_v1 }
  0xae   :  { %545 = vmatpush3.bf16.msra.mxu0 %v544_v30 }
 0x163   :  { %v113_v34 = vpop.f32.mrb[0].mxu0 }
 0x164   :  { %v118_v35 = vrot.slane %v113_v34, 4  ;;  %v125_v36 = vmul.f32 %v113_v34, %v113_v34  ;;  %v424_v37 = vpop.f32.mrb[1].mxu0 }
 0x166   :  { %v119_v38 = vadd.f32 %v118_v35, %v113_v34  ;;  %v126_v39 = vrot.slane %v125_v36, 4 }
 0x168   :  { %v120_v40 = vrot.slane %v119_v38, 2  ;;  %v127_v41 = vadd.f32 %v126_v39, %v125_v36 }
 0x16a   :  { %v121_v42 = vadd.f32 %v120_v40, %v119_v38  ;;  %v128_v43 = vrot.slane %v127_v41, 2 }
 0x16c   :  { %v122_v44 = vrot.slane %v121_v42, 1  ;;  %v129_v45 = vadd.f32 %v128_v43, %v127_v41 }
 0x16e   :  { %v123_v46 = vadd.f32 %v122_v44, %v121_v42  ;;  %v130_v47 = vrot.slane %v129_v45, 1 }
 0x170   :  { %v124_v48 = vmul.f32 0.125, %v123_v46  ;;  %v131_v49 = vadd.f32 %v130_v47, %v129_v45 }
 0x172   :  { %v132_v50 = vmul.f32 0.125, %v131_v49  ;;  %v133_v51 = vmul.f32 %v124_v48, %v124_v48 }
 0x174   :  { %v134_v52 = vsub.f32 %v132_v50, %v133_v51  ;;  %v241_v51 = vld [vmem:[#allocation3 + $0xa0] sm:$0x3] }
 0x176   :  { %v135_v53 = vmax.f32 %v134_v52, 0.0 }
 0x178   :  { %v136_v54 = vadd.f32 1e-05, %v135_v53 }
 0x17a   :  { %553 = vrsqrt.f32 %v136_v54 }
 0x184   :  { %v554_v58 = vpop.eup %553 }
 0x185   :  { %v138_v59 = vmul.f32 %v554_v58, %v117_v57 }
 0x187   :  { %v139_v61 = vmul.f32 %v138_v59, %v124_v48  ;;  %v147_v62 = vrot.slane %v138_v59, %v146_v60 }
 0x189   :  { %v141_v63 = vrot.slane %v139_v61, 7  ;;  %v148_v3 = vmul.f32 %v147_v62, %v113_v34 }
 0x18b   :  { %v143_v2 = vsub.f32 %v117_v57, %v141_v63 }
 0x18d   :  { %v152_v4 = vrot.slane %v143_v2, %v151_v0  ;;  %v377_v2 = vld [vmem:[#allocation3 + $0x128] ss:$0 sm:$0xff] }
 0x18f   :  { %v153_v5 = vadd.f32 %v152_v4, %v148_v3 }
 0x191   :  { %v154_v6 = vmax.f32 %v153_v5, 0.0 }
 0x193   :  { %458 = vmatmul.mubr.f32.vlgmr.msra.gmra.mrb[0].mxu1 %v154_v6 }
 0x266   :  { %v237_v31 = vpop.f32.mrb[0].mxu1 }
 0x267   :  { %v242_v32 = vrot.slane %v237_v31, 4  ;;  %v249_v33 = vmul.f32 %v237_v31, %v237_v31  ;;  %v459_v34 = vpop.f32.mrb[1].mxu1 }
 0x269   :  { %v243_v35 = vadd.f32 %v242_v32, %v237_v31  ;;  %v250_v36 = vrot.slane %v249_v33, 4 }
 0x26b   :  { %v244_v37 = vrot.slane %v243_v35, 2  ;;  %v251_v38 = vadd.f32 %v250_v36, %v249_v33 }
 0x26d   :  { %v245_v39 = vadd.f32 %v244_v37, %v243_v35  ;;  %v252_v40 = vrot.slane %v251_v38, 2 }
 0x26f   :  { %v246_v41 = vrot.slane %v245_v39, 1  ;;  %v253_v42 = vadd.f32 %v252_v40, %v251_v38 }
 0x271   :  { %v247_v43 = vadd.f32 %v246_v41, %v245_v39  ;;  %v254_v44 = vrot.slane %v253_v42, 1 }
 0x273   :  { %v248_v45 = vmul.f32 0.125, %v247_v43  ;;  %v255_v1 = vadd.f32 %v254_v44, %v253_v42 }
 0x275   :  { %v256_v46 = vmul.f32 0.125, %v255_v1  ;;  %v257_v47 = vmul.f32 %v248_v45, %v248_v45 }
 0x277   :  { %v258_v48 = vsub.f32 %v256_v46, %v257_v47 }
 0x279   :  { %v259_v49 = vmax.f32 %v258_v48, 0.0 }
 0x27b   :  { %v260_v50 = vadd.f32 1e-05, %v259_v49 }
 0x27d   :  { %555 = vrsqrt.f32 %v260_v50 }
 0x287   :  { %v556_v52 = vpop.eup %555 }
 0x288   :  { %v262_v53 = vmul.f32 %v556_v52, %v241_v51 }
 0x28a   :  { %v263_v54 = vmul.f32 %v262_v53, %v248_v45  ;;  %v271_v57 = vrot.slane %v262_v53, %v146_v60 }
 0x28c   :  { %v265_v55 = vrot.slane %v263_v54, 7  ;;  %v272_v59 = vmul.f32 %v271_v57, %v237_v31 }
 0x28e   :  { %v267_v58 = vsub.f32 %v241_v51, %v265_v55 }
 0x290   :  { %v276_v61 = vrot.slane %v267_v58, %v151_v0 }
 0x292   :  { %v277_v62 = vadd.f32 %v276_v61, %v272_v59 }
 0x294   :  { %v278_v63 = vmax.f32 %v277_v62, 0.0 }
 0x296   :  { %493 = vmatmul.mubr.f32.vlgmr.msra.gmra.mrb[2].mxu0 %v278_v63 }
 0x369   :  { %v366_v3 = vpop.f32.mrb[2].mxu0 }
 0x36a   :  { %v367_v4 = vadd.f32 %v377_v2, %v366_v3  ;;  %v494_v5 = vpop.f32.mrb[3].mxu0 }
 0x36c   :  { %370 = vst [vmem:[%s666_s3] sm:$0xff] %v367_v4 }
 0x36d   :  { %375 = vsyncpa [#allocation4], 1 }

</bundles_post_ra>
